<compile_context>
chip_gen: v7x
topology: tpu7x:2x2x1
jax: 0.10.0
libtpu: 0.0.40
codegen_flags: <defaults>
</compile_context>

<pallas_src>
import functools

import jax
import jax.numpy as jnp
import numpy as np
from jax.experimental import pallas as pl
from jax.experimental.pallas import tpu as pltpu

_EPS = 1e-6  # matches torch.nn.functional.pairwise_distance default eps


def _round_up(x, m):
    return (x + m - 1) // m * m


# ----------------------------- Pallas kernel ------------------------------ #
def _contrastive_tile_kernel(a_ref, p_ref, n_ref, out_ref, *,
                             margin, n_rows, tile_rows, d, d_pad):
    """One (tile_rows, d_pad) tile of triplets -> one partial loss sum.

    a_ref / p_ref / n_ref : (tile_rows, d_pad) anchor / positive / negative
    out_ref               : (1, 8, 128) f32; tile's partial sum broadcast
                            (lane-dense unmasked store; wrapper reads [0,0,0])
    """
    a = a_ref[...].astype(jnp.float32)
    p = p_ref[...].astype(jnp.float32)
    n = n_ref[...].astype(jnp.float32)

    # torch pairwise_distance adds eps to the difference; apply it only on the
    # real feature lanes so zero-padded columns contribute exactly 0.
    col = jax.lax.broadcasted_iota(jnp.int32, (1, d_pad), 1)
    eps_row = jnp.where(col < d, jnp.float32(_EPS), jnp.float32(0.0))

    d_pos = a - p + eps_row
    d_neg = a - n + eps_row

    pos_sq = jnp.sum(d_pos * d_pos, axis=1, keepdims=True)        # (T, 1)
    neg_sq = jnp.sum(d_neg * d_neg, axis=1, keepdims=True)        # (T, 1)
    neg_dist = jnp.sqrt(neg_sq)
    hinge = jnp.maximum(jnp.float32(margin) - neg_dist, 0.0)
    neg_loss = hinge * hinge

    # Mask rows that exist only because M was rounded up to a tile multiple.
    row = (pl.program_id(0) * tile_rows
           + jax.lax.broadcasted_iota(jnp.int32, (tile_rows, 1), 0))
    valid = (row < n_rows).astype(jnp.float32)

    partial = jnp.sum(valid * (pos_sq + neg_loss))
    out_ref[...] = jnp.full((1, 8, 128), partial, dtype=jnp.float32)


# ------------------------------ glue (JAX) -------------------------------- #
def _contrastive_loss(anchor, positive, negative, *, margin, block_rows=None):
    """mean(cat(||a-p||^2, clamp(margin - ||a-n||, 0)^2)) via a tiled Pallas kernel."""
    m, d = anchor.shape
    d_pad = _round_up(d, 128)                         # lane-dense feature dim

    # Row-tile sizing: keep a (tile_rows, d_pad) f32 block <= ~1 MiB so
    # 3 inputs x 2 pipeline buffers (~6 MiB) fit the default scoped VMEM on
    # every generation (v5e 16 MiB, v6e 32 MiB, v7x 32 MiB of 64 MiB physical).
    if block_rows is None:
        cap = max(8, min(1024, ((1 << 20) // (d_pad * 4)) // 8 * 8))
        tile_rows = min(cap, _round_up(m, 8))
    else:
        tile_rows = _round_up(max(8, min(int(block_rows), m)), 8)
    m_pad = _round_up(m, tile_rows)
    grid = (m_pad // tile_rows,)

    def pad(x):
        return jnp.pad(x, ((0, m_pad - m), (0, d_pad - d)))

    a, p, n = pad(anchor), pad(positive), pad(negative)

    kernel = functools.partial(
        _contrastive_tile_kernel,
        margin=float(margin), n_rows=m, tile_rows=tile_rows, d=d, d_pad=d_pad)

    row_spec = pl.BlockSpec((tile_rows, d_pad), lambda i: (i, 0))
    partials = pl.pallas_call(
        kernel,
        out_shape=jax.ShapeDtypeStruct((grid[0], 8, 128), jnp.float32),
        grid=grid,
        in_specs=[row_spec, row_spec, row_spec],
        out_specs=pl.BlockSpec((1, 8, 128), lambda i: (i, 0, 0)),
        compiler_params=pltpu.CompilerParams(
            dimension_semantics=("parallel",)),       # megacore sharding (v7x)
    )(a, p, n)

    # mean over cat(pos_loss, neg_loss): 2*m elements; single scale at the end.
    return jnp.sum(partials[:, 0, 0]) * (1.0 / (2.0 * m))


def _loss_from_indices(embeddings, anchor_idx, pos_idx, neg_idx, *, margin):
    """Gather triplet rows (XLA) then run the Pallas loss kernel."""
    a = jnp.take(embeddings, anchor_idx, axis=0)
    p = jnp.take(embeddings, pos_idx, axis=0)
    n = jnp.take(embeddings, neg_idx, axis=0)
    return _contrastive_loss(a, p, n, margin=margin)


def simple_triplet_sampler(embeddings, labels):
    """Deterministic example sampler (the PyTorch module expects one injected):
    anchor = every index; positive = first *other* index with same label
    (fallback: itself); negative = first index with a different label
    (fallback: next index)."""
    del embeddings  # label-based sampler
    n = labels.shape[0]
    idx = jnp.arange(n, dtype=jnp.int32)
    same = labels[:, None] == labels[None, :]
    eye = idx[:, None] == idx[None, :]
    pos_mask = same & (~eye)
    neg_mask = ~same
    pos_idx = jnp.where(jnp.any(pos_mask, axis=1),
                        jnp.argmax(pos_mask, axis=1).astype(jnp.int32), idx)
    neg_idx = jnp.where(jnp.any(neg_mask, axis=1),
                        jnp.argmax(neg_mask, axis=1).astype(jnp.int32),
                        (idx + 1) % n)
    return idx, pos_idx, neg_idx


class ContrastiveLoss:
    """JAX/Pallas port of metric.loss.ContrastiveLoss (no learned parameters)."""

    def __init__(self, margin=0.2, sampler=None):
        self.margin = float(margin)
        self.sampler = sampler if sampler is not None else simple_triplet_sampler
        # Gather + Pallas kernel + final reduction jitted as one dispatch.
        self._loss = jax.jit(functools.partial(_loss_from_indices,
                                               margin=self.margin))

    def forward(self, embeddings, labels):
        # TODO(synk): user-supplied samplers may be arbitrary Python, so the
        # sampler stays outside the jitted gather+kernel path.
        anchor_idx, pos_idx, neg_idx = self.sampler(embeddings, labels)
        return self._loss(embeddings, anchor_idx, pos_idx, neg_idx)

    __call__ = forward


# -------------------------- pure-JAX reference ----------------------------- #
def _reference_loss(anchor, positive, negative, margin):
    """Literal translation of the PyTorch math (incl. pairwise_distance eps)."""
    pos_d = jnp.sqrt(jnp.sum((anchor - positive + _EPS) ** 2, axis=1))
    neg_d = jnp.sqrt(jnp.sum((anchor - negative + _EPS) ** 2, axis=1))
    pos_loss = pos_d ** 2
    neg_loss = jnp.maximum(margin - neg_d, 0.0) ** 2
    return jnp.mean(jnp.concatenate([pos_loss, neg_loss]))


# --------------------------------- main ------------------------------------ #
if __name__ == "__main__":
    key = jax.random.PRNGKey(0)
    k_emb, k_lab, k_a, k_p, k_n = jax.random.split(key, 5)

    # 1) Full module forward: sampler -> gather -> Pallas loss.
    N, D = 16, 32
    embeddings = jax.random.normal(k_emb, (N, D), jnp.float32)
    labels = jax.random.randint(k_lab, (N,), 0, 4, dtype=jnp.int32)

    model = ContrastiveLoss(margin=0.2)
    loss = jax.block_until_ready(model(embeddings, labels))

    ai, pi, ni = simple_triplet_sampler(embeddings, labels)
    ref = _reference_loss(embeddings[ai], embeddings[pi], embeddings[ni], 0.2)
    if not np.allclose(np.asarray(loss), np.asarray(ref), rtol=1e-4, atol=1e-5):
        raise AssertionError(f"mismatch (module): pallas={loss} ref={ref}")

    # 2) Multi-tile grid path (row padding + parallel grid across 3 tiles).
    M2, D2 = 40, 32
    a2 = jax.random.normal(k_a, (M2, D2), jnp.float32)
    p2 = jax.random.normal(k_p, (M2, D2), jnp.float32)
    n2 = jax.random.normal(k_n, (M2, D2), jnp.float32)
    loss2 = jax.block_until_ready(
        _contrastive_loss(a2, p2, n2, margin=0.5, block_rows=16))
    ref2 = _reference_loss(a2, p2, n2, 0.5)
    if not np.allclose(np.asarray(loss2), np.asarray(ref2), rtol=1e-4, atol=1e-5):
        raise AssertionError(f"mismatch (tiled): pallas={loss2} ref={ref2}")

    print("KERNEL_OK")
</pallas_src>

<mosaic_0001>
module attributes {stable_mosaic.version = 11 : i64} {
  func.func @_contrastive_tile_kernel(%arg0: i32, %arg1: memref<16x128xf32, #tpu.memory_space<vmem>>, %arg2: memref<16x128xf32, #tpu.memory_space<vmem>>, %arg3: memref<16x128xf32, #tpu.memory_space<vmem>>, %arg4: memref<1x8x128xf32, #tpu.memory_space<vmem>>) attributes {dimension_semantics = [#tpu.dimension_semantics<parallel>], iteration_bounds = array<i64: 1>, scalar_prefetch = 0 : i64, scratch_operands = 0 : i64, tpu.core_type = #tpu.core_type<tc>, window_params = [{transform_indices = @transform_0, window_bounds = array<i64: 16, 128>}, {transform_indices = @transform_1, window_bounds = array<i64: 16, 128>}, {transform_indices = @transform_2, window_bounds = array<i64: 16, 128>}, {transform_indices = @transform_3, window_bounds = array<i64: 1, 8, 128>}]} {
    %c0 = arith.constant 0 : index
    %c0_0 = arith.constant 0 : index
    %0 = vector.load %arg1[%c0, %c0_0] : memref<16x128xf32, #tpu.memory_space<vmem>>, vector<16x128xf32>
    %c0_1 = arith.constant 0 : index
    %c0_2 = arith.constant 0 : index
    %1 = vector.load %arg2[%c0_1, %c0_2] : memref<16x128xf32, #tpu.memory_space<vmem>>, vector<16x128xf32>
    %c0_3 = arith.constant 0 : index
    %c0_4 = arith.constant 0 : index
    %2 = vector.load %arg3[%c0_3, %c0_4] : memref<16x128xf32, #tpu.memory_space<vmem>>, vector<16x128xf32>
    %3 = tpu.iota {dimensions = array<i32: 1>} : vector<1x128xi32>
    %c32_i32 = arith.constant 32 : i32
    %4 = vector.broadcast %c32_i32 : i32 to vector<1x128xi32>
    %5 = arith.cmpi slt, %3, %4 : vector<1x128xi32>
    %cst = arith.constant 9.99999997E-7 : f32
    %cst_5 = arith.constant 0.000000e+00 : f32
    %6 = vector.broadcast %cst : f32 to vector<1x128xf32>
    %7 = vector.broadcast %cst_5 : f32 to vector<1x128xf32>
    %8 = arith.select %5, %6, %7 : vector<1x128xi1>, vector<1x128xf32>
    %9 = arith.subf %0, %1 : vector<16x128xf32>
    %10 = vector.broadcast %8 : vector<1x128xf32> to vector<16x128xf32>
    %11 = arith.addf %9, %10 : vector<16x128xf32>
    %12 = arith.subf %0, %2 : vector<16x128xf32>
    %13 = vector.broadcast %8 : vector<1x128xf32> to vector<16x128xf32>
    %14 = arith.addf %12, %13 : vector<16x128xf32>
    %15 = arith.mulf %11, %11 : vector<16x128xf32>
    %cst_6 = arith.constant dense<0.000000e+00> : vector<16xf32>
    %16 = vector.multi_reduction <add>, %15, %cst_6 [1] : vector<16x128xf32> to vector<16xf32>
    %17 = vector.shape_cast %16 : vector<16xf32> to vector<16x1xf32>
    %18 = arith.mulf %14, %14 : vector<16x128xf32>
    %cst_7 = arith.constant dense<0.000000e+00> : vector<16xf32>
    %19 = vector.multi_reduction <add>, %18, %cst_7 [1] : vector<16x128xf32> to vector<16xf32>
    %20 = vector.shape_cast %19 : vector<16xf32> to vector<16x1xf32>
    %21 = math.sqrt %20 : vector<16x1xf32>
    %cst_8 = arith.constant 2.000000e-01 : f32
    %22 = vector.broadcast %cst_8 : f32 to vector<16x1xf32>
    %23 = arith.subf %22, %21 : vector<16x1xf32>
    %cst_9 = arith.constant 0.000000e+00 : f32
    %24 = vector.broadcast %cst_9 : f32 to vector<16x1xf32>
    %25 = arith.maximumf %23, %24 : vector<16x1xf32>
    %26 = arith.mulf %25, %25 : vector<16x1xf32>
    %c16_i32 = arith.constant 16 : i32
    %27 = arith.muli %arg0, %c16_i32 : i32
    %28 = tpu.iota {dimensions = array<i32: 0>} : vector<16x1xi32>
    %29 = vector.broadcast %27 : i32 to vector<16x1xi32>
    %30 = arith.addi %29, %28 : vector<16x1xi32>
    %c16_i32_10 = arith.constant 16 : i32
    %31 = vector.broadcast %c16_i32_10 : i32 to vector<16x1xi32>
    %32 = arith.cmpi slt, %30, %31 : vector<16x1xi32>
    %33 = arith.extui %32 : vector<16x1xi1> to vector<16x1xi32>
    %34 = arith.sitofp %33 : vector<16x1xi32> to vector<16x1xf32>
    %35 = arith.addf %17, %26 : vector<16x1xf32>
    %36 = arith.mulf %34, %35 : vector<16x1xf32>
    %37 = vector.shape_cast %36 : vector<16x1xf32> to vector<1x16x1xf32>
    %cst_11 = arith.constant dense<0.000000e+00> : vector<1xf32>
    %38 = vector.multi_reduction <add>, %37, %cst_11 [1, 2] : vector<1x16x1xf32> to vector<1xf32>
    %39 = vector.shape_cast %38 : vector<1xf32> to vector<1x1x1xf32>
    %40 = vector.extract %39[0, 0, 0] : f32 from vector<1x1x1xf32>
    %41 = vector.broadcast %40 : f32 to vector<1x8x128xf32>
    %c0_12 = arith.constant 0 : index
    %c0_13 = arith.constant 0 : index
    %c0_14 = arith.constant 0 : index
    %42 = vector.load %arg4[%c0_12, %c0_13, %c0_14] : memref<1x8x128xf32, #tpu.memory_space<vmem>>, vector<1x8x128xf32>
    tpu.vector_store %arg4[%c0_12, %c0_13, %c0_14], %41 {strides = array<i32>} : memref<1x8x128xf32, #tpu.memory_space<vmem>>, vector<1x8x128xf32>,
    return
  }
  func.func @transform_0(%arg0: i32) -> (i32, i32) {
    %c0_i32 = arith.constant 0 : i32
    %c0_i32_0 = arith.constant 0 : i32
    return %arg0, %c0_i32 : i32, i32
  }
  func.func @transform_1(%arg0: i32) -> (i32, i32) {
    %c0_i32 = arith.constant 0 : i32
    %c0_i32_0 = arith.constant 0 : i32
    return %arg0, %c0_i32 : i32, i32
  }
  func.func @transform_2(%arg0: i32) -> (i32, i32) {
    %c0_i32 = arith.constant 0 : i32
    %c0_i32_0 = arith.constant 0 : i32
    return %arg0, %c0_i32 : i32, i32
  }
  func.func @transform_3(%arg0: i32) -> (i32, i32, i32) {
    %c0_i32 = arith.constant 0 : i32
    %c0_i32_0 = arith.constant 0 : i32
    %c0_i32_1 = arith.constant 0 : i32
    return %arg0, %c0_i32, %c0_i32_0 : i32, i32, i32
  }
}

</mosaic_0001>

<bundles_post_ra>
// kernel: _loss_from_indices.1
= control target key start
LH: loop header
LB: loop body
LE: loop exit
PB: predicated region body
PF: predicated region fallthrough
CT: control target
= control target key end

     0   :  { %v20_v0 = vlaneseq  ;;  %v107_v12 = vmov 0.0   ;;  %vm81_vm5 = vcmask 7168   ;;  %s149_s0 = inlined_call_operand.vmem [shape: f32[16,128], index: 0, kind: input, shape index: {}]   ;;  %s150_s2 = inlined_call_operand.vmem [shape: f32[16,128], index: 2, kind: input, shape index: {}]   ;;  %s151_s1 = inlined_call_operand.vmem [shape: f32[16,128], index: 1, kind: input, shape index: {}]   ;;  %s152_s3 = inlined_call_operand.vmem [shape: f32[1,8,128], index: 3, kind: output, shape index: {}]  }
   0x1   :  { %v14_v1 = vld [vmem:[%s149_s0] sm:$0xff]  ;;  %v15_v3 = vld [vmem:[%s149_s0 + $0x8] sm:$0xff] }
   0x2   :  { %v18_v2 = vld [vmem:[%s150_s2] sm:$0xff]  ;;  %v21_v4 = vand.u32 127, %v20_v0  ;;  %v19_v6 = vld [vmem:[%s150_s2 + $0x8] sm:$0xff] }
   0x3   :  { %v28_v5 = vsub.f32 %v14_v1, %v18_v2  ;;  %v16_v7 = vld [vmem:[%s151_s1] sm:$0xff]  ;;  %v17_v8 = vld [vmem:[%s151_s1 + $0x8] sm:$0xff]  ;;  %v29_v9 = vsub.f32 %v15_v3, %v19_v6 }
   0x4   :  { %v24_v10 = vsub.f32 %v14_v1, %v16_v7  ;;  %v25_v11 = vsub.f32 %v15_v3, %v17_v8  ;;  %vm22_vm0 = vcmp.lt.s32.totalorder %v21_v4, 32 }
   0x5   :  { %v23_v13 = vsel %vm22_vm0, 1e-06, %v107_v12 }
   0x6   :  { %v30_v14 = vadd.f32 %v28_v5, %v23_v13  ;;  %v31_v15 = vadd.f32 %v29_v9, %v23_v13  ;;  %v26_v16 = vadd.f32 %v24_v10, %v23_v13  ;;  %v27_v17 = vadd.f32 %v25_v11, %v23_v13 }
   0x8   :  { %v38_v18 = vmul.f32 %v30_v14, %v30_v14  ;;  %v32_v19 = vmul.f32 %v26_v16, %v26_v16  ;;  %v39_v20 = vmul.f32 %v31_v15, %v31_v15  ;;  %v33_v21 = vmul.f32 %v27_v17, %v27_v17 }
   0xa   :  { %40 = vadd.xlane.f32.xlu0 %v38_v18  ;;  %34 = vadd.xlane.f32.xlu1 %v32_v19 }
   0xe   :  { %42 = vadd.xlane.f32.xlu0 %v39_v20  ;;  %36 = vadd.xlane.f32.xlu1 %v33_v21 }
  0x97   :  { %v41_v22 = vpop.xlane.xlu0 %40  ;;  %v35_v32 = vpop.xlane.xlu1 %34 }
  0x98   :  { %103 = vrsqrt.f32 %v41_v22  ;;  %vm46_vm1 = vcmp.eq.f32.partialorder %v41_v22, inf  ;;  %v49_v26 = vand.u32 2147483648, %v41_v22  ;;  %vm48_vm2 = vcmp.eq.f32.partialorder %v41_v22, 0.0 }
  0x9b   :  { %v43_v23 = vpop.xlane.xlu0 %42  ;;  %v37_v40 = vpop.xlane.xlu1 %36 }
  0x9c   :  { %105 = vrsqrt.f32 %v43_v23  ;;  %vm53_vm3 = vcmp.eq.f32.partialorder %v43_v23, inf  ;;  %v56_v33 = vand.u32 2147483648, %v43_v23  ;;  %vm55_vm4 = vcmp.eq.f32.partialorder %v43_v23, 0.0 }
  0xa2   :  { %v104_v24 = vpop.eup %103 }
  0xa3   :  { %v45_v25 = vmul.f32 %v104_v24, %v41_v22 }
  0xa5   :  { %v47_v27 = vsel %vm46_vm1, %v41_v22, %v45_v25 }
  0xa6   :  { %v106_v28 = vpop.eup %105  ;;  %v50_v29 = vsel %vm48_vm2, %v49_v26, %v47_v27 }
  0xa7   :  { %v58_v30 = vsub.f32 0.2, %v50_v29  ;;  %v52_v31 = vmul.f32 %v106_v28, %v43_v23 }
  0xa9   :  { %v60_v34 = vmax.f32 %v58_v30, 0.0  ;;  %v54_v35 = vsel %vm53_vm3, %v43_v23, %v52_v31 }
  0xaa   :  { %v57_v36 = vsel %vm55_vm4, %v56_v33, %v54_v35 }
  0xab   :  { %v62_v37 = vmul.f32 %v60_v34, %v60_v34  ;;  %v59_v38 = vsub.f32 0.2, %v57_v36 }
  0xad   :  { %v61_v39 = vmax.f32 %v59_v38, 0.0  ;;  %v77_v41 = vadd.f32 %v62_v37, %v35_v32 }
  0xaf   :  { %v63_v42 = vmul.f32 %v61_v39, %v61_v39  ;;  %v82_v44 = vsel %vm81_vm5, %v77_v41, 0.0 }
  0xb1   :  { %v78_v43 = vadd.f32 %v63_v42, %v37_v40 }
  0xb3   :  { %v83_v45 = vsel %vm81_vm5, %v78_v43, 0.0 }
  0xb4   :  { %v84_v46 = vadd.f32 %v83_v45, %v82_v44 }
  0xb6   :  { %85 = vadd.xlane.f32.xlu0 %v84_v46 }
 0x143   :  { %v86_v47 = vpop.xlane.xlu0 %85 }
 0x144   :  { %v87_v48 = vrot.slane %v86_v47, 4 }
 0x146   :  { %v88_v49 = vadd.f32 %v87_v48, %v86_v47 }
 0x148   :  { %v89_v50 = vrot.slane %v88_v49, 2 }
 0x14a   :  { %v90_v51 = vadd.f32 %v89_v50, %v88_v49 }
 0x14c   :  { %v91_v52 = vrot.slane %v90_v51, 1 }
 0x14e   :  { %v92_v53 = vadd.f32 %v91_v52, %v90_v51 }
 0x150   :  { %100 = vpush %v92_v53 }
 0x181   :  { %s101_s0 = spop %100 }
 0x182   :  { %v94_v54 = vstv %s101_s0 }
 0x183   :  { %95 = vst [vmem:[%s152_s3] sm:$0xff] %v94_v54 }

</bundles_post_ra>
